<compile_context>
chip_gen: v7x
topology: tpu7x:2x2x1
jax: 0.10.0
libtpu: 0.0.40
codegen_flags: <defaults>
</compile_context>

<pallas_src>
import math
import functools

import jax
import jax.numpy as jnp
from jax import lax
from jax.experimental import pallas as pl
from jax.experimental.pallas import tpu as pltpu


# ----------------------------------------------------------------------------
# Kernel 1: fused QKV projection + rotary embedding, head-major outputs.
# grid = (batch, seq_block)
# ----------------------------------------------------------------------------
def _qkv_rope_kernel(x_ref, w_ref, cos_ref, sin_ref, q_ref, k_ref, v_ref,
                     *, num_heads, num_kv_heads, head_dim):
    d = head_dim
    d2 = d // 2
    h2 = num_heads * d2
    k2 = num_kv_heads * d2

    x = x_ref[0]                                                # (Sb, H) bf16
    # Single wide MXU matmul: W = [Qe | Qo | Ke | Ko | V] (bf16 in, f32 acc).
    # The Q/K columns are pre-split per head into even/odd groups so RoPE is
    # pure element-wise math; the 1/sqrt(D) scale is already folded into Qe/Qo.
    # TODO(synk): for very large H on v7x, add an output-column grid axis so
    # only a slice of this weight is resident (stream it from HBM).
    proj = jnp.dot(x, w_ref[...], preferred_element_type=jnp.float32)

    qe = proj[:, :h2]
    qo = proj[:, h2:2 * h2]
    ke = proj[:, 2 * h2:2 * h2 + k2]
    ko = proj[:, 2 * h2 + k2:2 * h2 + 2 * k2]
    vp = proj[:, 2 * h2 + 2 * k2:]

    cos = cos_ref[...]                                          # (Sb, D/2) f32
    sin = sin_ref[...]
    cq = jnp.tile(cos, (1, num_heads))                          # in-kernel head tile
    sq = jnp.tile(sin, (1, num_heads))
    ck = jnp.tile(cos, (1, num_kv_heads))
    sk = jnp.tile(sin, (1, num_kv_heads))

    # Interleaved RoPE on the packed even/odd layout:
    #   out_even = e*cos - o*sin ; out_odd = o*cos + e*sin
    q_even = qe * cq - qo * sq
    q_odd = qo * cq + qe * sq
    k_even = ke * ck - ko * sk
    k_odd = ko * ck + ke * sk

    # Head-major stores (static slices; heads packed as [even D/2 | odd D/2],
    # a fixed per-head permutation shared by q and k so q.k^T is unchanged).
    for h in range(num_heads):
        sl = slice(h * d2, (h + 1) * d2)
        q_ref[0, h] = jnp.concatenate([q_even[:, sl], q_odd[:, sl]],
                                      axis=-1).astype(q_ref.dtype)
    for g in range(num_kv_heads):
        sl = slice(g * d2, (g + 1) * d2)
        k_ref[0, g] = jnp.concatenate([k_even[:, sl], k_odd[:, sl]],
                                      axis=-1).astype(k_ref.dtype)
        v_ref[0, g] = vp[:, g * d:(g + 1) * d].astype(v_ref.dtype)


# ----------------------------------------------------------------------------
# Kernel 2: GQA flash attention with online softmax.
# grid = (batch, kv_head, q_block, kv_block); kv_block axis is "arbitrary".
# The `rep` query heads sharing a KV head are folded into the matmul rows.
# ----------------------------------------------------------------------------
def _flash_attention_kernel(q_ref, k_ref, v_ref, bias_ref, o_ref,
                            m_sc, l_sc, acc_sc):
    ki = pl.program_id(3)

    @pl.when(ki == 0)
    def _init():
        m_sc[...] = jnp.full(m_sc.shape, -jnp.inf, dtype=m_sc.dtype)
        l_sc[...] = jnp.zeros(l_sc.shape, dtype=l_sc.dtype)
        acc_sc[...] = jnp.zeros(acc_sc.shape, dtype=acc_sc.dtype)

    rep = q_ref.shape[1]
    sq = q_ref.shape[2]
    d = q_ref.shape[3]

    q = q_ref[0].reshape(rep * sq, d)                           # bf16, pre-scaled
    k = k_ref[0, 0]                                             # (Skv, D) bf16
    v = v_ref[0, 0]                                             # (Skv, D) bf16

    s = lax.dot_general(q, k, (((1,), (1,)), ((), ())),
                        preferred_element_type=jnp.float32)     # (rep*Sq, Skv) f32
    # Mask bias is resident for the whole row; slice the current kv block here
    # instead of DMAing a tiny block every inner step.
    s = s + bias_ref[0, pl.ds(ki, 1)]                           # (1, Skv) additive

    m_prev = m_sc[...]
    m_new = jnp.maximum(m_prev, jnp.max(s, axis=-1, keepdims=True))
    alpha = jnp.exp(m_prev - m_new)
    # TODO(synk): on v6e/v7x a bf16 exponent (jnp.exp((s - m_new).astype(bf16)))
    # roughly doubles EUP throughput; kept f32 here for portability (v5e).
    p = jnp.exp(s - m_new)
    l_sc[...] = alpha * l_sc[...] + jnp.sum(p, axis=-1, keepdims=True)
    acc_sc[...] = alpha * acc_sc[...] + jnp.dot(
        p.astype(v.dtype), v, preferred_element_type=jnp.float32)
    m_sc[...] = m_new

    @pl.when(ki == pl.num_programs(3) - 1)
    def _finalize():
        out = (acc_sc[...] / l_sc[...]).reshape(rep, sq, d)     # exact normalize
        # Write directly into the (q_block, rep*D) context slab: heads of this
        # kv group are contiguous columns (natural repeat_interleave order).
        for r in range(rep):
            o_ref[0, 0, :, r * d:(r + 1) * d] = out[r].astype(o_ref.dtype)


# ----------------------------------------------------------------------------
# Kernel 3: output projection, streaming Wo over output-column tiles.
# grid = (batch, seq_block, out_col_block)
# ----------------------------------------------------------------------------
def _out_proj_kernel(ctx_ref, wo_ref, o_ref):
    nkv = ctx_ref.shape[1]
    # Accumulate per kv-group: ctx[:, g] (Sb, rep*D) x Wo rows for that group.
    # This fuses the kv-group -> hidden regroup into the contraction (no HBM
    # transpose of the context tensor).
    acc = jnp.dot(ctx_ref[0, 0], wo_ref[0], preferred_element_type=jnp.float32)
    for g in range(1, nkv):
        acc += jnp.dot(ctx_ref[0, g], wo_ref[g],
                       preferred_element_type=jnp.float32)
    # TODO(synk): for extremely large H also tile the contraction (K) axis with
    # an f32 VMEM accumulator + pl.when init/finalize.
    o_ref[0] = acc.astype(o_ref.dtype)


# ----------------------------------------------------------------------------
# Block-size helper: largest block <= cap that divides `size` and is a
# multiple of `multiple` (bf16 sublane packing wants 16; lane dim wants 128).
# ----------------------------------------------------------------------------
def _pick_block(size, cap, multiple=16):
    if size <= cap:
        return size
    start = cap - (cap % multiple)
    for b in range(start, multiple - 1, -multiple):
        if size % b == 0:
            return b
    # TODO(synk): pad `size` (cdiv grid + masking) instead of a full-extent
    # block for awkward sizes; full-extent fallback only hits odd lengths.
    return size


# ----------------------------------------------------------------------------
# Wrapper: weight/table preparation and the three pallas_calls.
# ----------------------------------------------------------------------------
def vishwamai_attention(x, params, mask=None, *, num_heads, num_kv_heads,
                        rope_theta=10000.0, seq_block=None, q_block=None,
                        kv_block=None, out_col_block=None,
                        out_dtype=jnp.float32,
                        vmem_limit_bytes=48 * 1024 * 1024):
    wq_t, wk_t, wv_t, wo_t = params      # pre-transposed: (in_features, out_features)
    B, S, H = x.shape
    assert H % num_heads == 0 and num_heads % num_kv_heads == 0
    D = H // num_heads
    assert D % 2 == 0
    D2 = D // 2
    KVH = num_kv_heads * D
    rep = num_heads // num_kv_heads
    W_TOT = H + 2 * KVH
    scale = 1.0 / math.sqrt(D)
    compute_dtype = jnp.bfloat16

    # ---- block sizes (MXU-fill caps of 256 for v6e/v7x, bf16-aligned) ----
    seq_block = seq_block if seq_block is not None else _pick_block(S, 256)
    kv_block = kv_block if kv_block is not None else _pick_block(S, 256)
    if q_block is None:
        # keep the live f32 score tile (rep*q_block, kv_block) under ~512 KiB
        q_cap = max(16, min(256, (128 * 1024) // max(1, rep * kv_block)))
        q_block = _pick_block(S, q_cap)
    assert S % seq_block == 0 and S % q_block == 0 and S % kv_block == 0
    n_seq, n_q, n_kv = S // seq_block, S // q_block, S // kv_block

    if out_col_block is None:
        out_col_block = _pick_block(H, 512, multiple=128)
    assert H % out_col_block == 0
    n_on = H // out_col_block

    # ---- one concatenated projection weight [Qe | Qo | Ke | Ko | V] ----
    # even/odd head-major column gather; 1/sqrt(D) folded into the Q columns.
    def even_odd_cols(nheads):
        base = (jnp.arange(nheads)[:, None] * D
                + 2 * jnp.arange(D2)[None, :]).reshape(-1)
        return base, base + 1

    qi_e, qi_o = even_odd_cols(num_heads)
    ki_e, ki_o = even_odd_cols(num_kv_heads)
    w_cat = jnp.concatenate(
        [wq_t[:, qi_e] * scale, wq_t[:, qi_o] * scale,
         wk_t[:, ki_e], wk_t[:, ki_o], wv_t], axis=1).astype(compute_dtype)
    assert w_cat.shape == (H, W_TOT)

    # Wo rows grouped by kv head group (natural head order within a group).
    wo3 = wo_t.reshape(num_kv_heads, rep * D, H).astype(compute_dtype)

    # ---- RoPE tables: just (S, D/2); head tiling happens in-kernel ----
    freqs = 1.0 / (rope_theta ** (jnp.arange(0, D, 2, dtype=jnp.float32) / D))
    angles = jnp.outer(jnp.arange(S, dtype=jnp.float32), freqs)   # (S, D/2)
    cos, sin = jnp.cos(angles), jnp.sin(angles)

    x_c = x.astype(compute_dtype)

    # ---------------- kernel 1: QKV + RoPE (head-major outputs) ----------------
    q, k, v = pl.pallas_call(
        functools.partial(_qkv_rope_kernel, num_heads=num_heads,
                          num_kv_heads=num_kv_heads, head_dim=D),
        grid=(B, n_seq),
        in_specs=[
            pl.BlockSpec((1, seq_block, H), lambda b, s: (b, s, 0)),     # x
            pl.BlockSpec((H, W_TOT), lambda b, s: (0, 0)),               # W cat
            pl.BlockSpec((seq_block, D2), lambda b, s: (s, 0)),          # cos
            pl.BlockSpec((seq_block, D2), lambda b, s: (s, 0)),          # sin
        ],
        out_specs=(
            pl.BlockSpec((1, num_heads, seq_block, D), lambda b, s: (b, 0, s, 0)),
            pl.BlockSpec((1, num_kv_heads, seq_block, D), lambda b, s: (b, 0, s, 0)),
            pl.BlockSpec((1, num_kv_heads, seq_block, D), lambda b, s: (b, 0, s, 0)),
        ),
        out_shape=(
            jax.ShapeDtypeStruct((B, num_heads, S, D), compute_dtype),
            jax.ShapeDtypeStruct((B, num_kv_heads, S, D), compute_dtype),
            jax.ShapeDtypeStruct((B, num_kv_heads, S, D), compute_dtype),
        ),
        compiler_params=pltpu.CompilerParams(
            dimension_semantics=("parallel", "parallel"),
            vmem_limit_bytes=vmem_limit_bytes),
    )(x_c, w_cat, cos, sin)

    # additive mask bias, resident per batch: (B, n_kv, kv_block)
    if mask is None:
        bias = jnp.zeros((B, n_kv, kv_block), dtype=jnp.float32)
    else:
        bias = ((1.0 - mask.astype(jnp.float32)) * (-10000.0)).reshape(
            B, n_kv, kv_block)

    # ---------------- kernel 2: flash attention ----------------
    ctx = pl.pallas_call(
        _flash_attention_kernel,
        grid=(B, num_kv_heads, n_q, n_kv),
        in_specs=[
            pl.BlockSpec((1, rep, q_block, D),
                         lambda b, h, qi, ki: (b, h, qi, 0)),            # q group
            pl.BlockSpec((1, 1, kv_block, D),
                         lambda b, h, qi, ki: (b, h, ki, 0)),            # k block
            pl.BlockSpec((1, 1, kv_block, D),
                         lambda b, h, qi, ki: (b, h, ki, 0)),            # v block
            pl.BlockSpec((1, n_kv, kv_block),
                         lambda b, h, qi, ki: (b, 0, 0)),                # mask bias
        ],
        out_specs=pl.BlockSpec((1, 1, q_block, rep * D),
                               lambda b, h, qi, ki: (b, h, qi, 0)),
        out_shape=jax.ShapeDtypeStruct((B, num_kv_heads, S, rep * D),
                                       compute_dtype),
        scratch_shapes=[
            pltpu.VMEM((rep * q_block, 1), jnp.float32),   # running max
            pltpu.VMEM((rep * q_block, 1), jnp.float32),   # running sum
            pltpu.VMEM((rep * q_block, D), jnp.float32),   # output accumulator
        ],
        compiler_params=pltpu.CompilerParams(
            dimension_semantics=("parallel", "parallel", "parallel", "arbitrary"),
            vmem_limit_bytes=vmem_limit_bytes),
    )(q, k, v, bias)

    # ---------------- kernel 3: output projection (Wo streamed over N) ----------------
    out = pl.pallas_call(
        _out_proj_kernel,
        grid=(B, n_seq, n_on),
        in_specs=[
            pl.BlockSpec((1, num_kv_heads, seq_block, rep * D),
                         lambda b, s, n: (b, 0, s, 0)),                  # ctx slab
            pl.BlockSpec((num_kv_heads, rep * D, out_col_block),
                         lambda b, s, n: (0, 0, n)),                     # Wo slice
        ],
        out_specs=pl.BlockSpec((1, seq_block, out_col_block),
                               lambda b, s, n: (b, s, n)),
        # pass out_dtype=jnp.bfloat16 to halve writeback traffic when the
        # downstream consumer is bf16.
        out_shape=jax.ShapeDtypeStruct((B, S, H), out_dtype),
        compiler_params=pltpu.CompilerParams(
            dimension_semantics=("parallel", "parallel", "parallel"),
            vmem_limit_bytes=vmem_limit_bytes),
    )(ctx, wo3)
    return out


# ----------------------------------------------------------------------------
# Pure-JAX reference (mirrors the torch forward exactly, f32 math)
# ----------------------------------------------------------------------------
def reference_attention(x, params, mask=None, *, num_heads, num_kv_heads,
                        theta=10000.0):
    wq_t, wk_t, wv_t, wo_t = params
    B, S, H = x.shape
    D = H // num_heads
    rep = num_heads // num_kv_heads

    q = (x @ wq_t).reshape(B, S, num_heads, D)
    k = (x @ wk_t).reshape(B, S, num_kv_heads, D)
    v = (x @ wv_t).reshape(B, S, num_kv_heads, D)
    k = jnp.repeat(k, rep, axis=2)
    v = jnp.repeat(v, rep, axis=2)

    freqs = 1.0 / (theta ** (jnp.arange(0, D, 2, dtype=jnp.float32) / D))
    angles = jnp.outer(jnp.arange(S, dtype=jnp.float32), freqs)
    cis = jnp.exp(1j * angles.astype(jnp.complex64))

    def rope(a):
        a2 = a.reshape(B, S, -1, D // 2, 2)
        ac = lax.complex(a2[..., 0], a2[..., 1])
        out = ac * cis[None, :, None, :]
        return jnp.stack([out.real, out.imag], axis=-1).reshape(B, S, -1, D)

    q = rope(q)
    k = rope(k)

    scores = jnp.einsum('bthd,bshd->bhts', q, k) / math.sqrt(D)
    if mask is not None:
        scores = scores + (1.0 - mask)[:, None, None, :] * (-10000.0)
    w = jax.nn.softmax(scores, axis=-1)
    out = jnp.einsum('bhts,bshd->bthd', w, v).reshape(B, S, H)
    return out @ wo_t


# ----------------------------------------------------------------------------
if __name__ == "__main__":
    B, S, H = 2, 16, 32
    NUM_HEADS, NUM_KV_HEADS = 4, 2
    D = H // NUM_HEADS
    KVH = NUM_KV_HEADS * D
    ROPE_THETA = 10000.0

    key = jax.random.PRNGKey(0)
    kx, kq, kk, kv, ko = jax.random.split(key, 5)

    x = jax.random.normal(kx, (B, S, H), dtype=jnp.float32)
    wq_t = jax.random.normal(kq, (H, H), dtype=jnp.float32) / math.sqrt(H)
    wk_t = jax.random.normal(kk, (H, KVH), dtype=jnp.float32) / math.sqrt(H)
    wv_t = jax.random.normal(kv, (H, KVH), dtype=jnp.float32) / math.sqrt(H)
    wo_t = jax.random.normal(ko, (H, H), dtype=jnp.float32) / math.sqrt(H)
    params = (wq_t, wk_t, wv_t, wo_t)

    # attention mask with a few padded positions in batch 1
    mask = jnp.ones((B, S), dtype=jnp.float32).at[1, -4:].set(0.0)

    out = vishwamai_attention(x, params, mask=mask,
                              num_heads=NUM_HEADS, num_kv_heads=NUM_KV_HEADS,
                              rope_theta=ROPE_THETA)
    out = jax.block_until_ready(out)

    # Reference on the same bf16-rounded inputs (the kernel's precision policy)
    # computed in f32; isolates structural correctness from bf16 rounding.
    x_r = x.astype(jnp.bfloat16).astype(jnp.float32)
    params_r = tuple(w.astype(jnp.bfloat16).astype(jnp.float32) for w in params)
    ref = reference_attention(x_r, params_r, mask=mask,
                              num_heads=NUM_HEADS, num_kv_heads=NUM_KV_HEADS,
                              theta=ROPE_THETA)
    ref = jax.block_until_ready(ref)

    assert out.shape == (B, S, H), out.shape
    max_err = float(jnp.max(jnp.abs(out - ref)))
    assert max_err < 5e-2, f"max abs error {max_err}"

    print("KERNEL_OK")
</pallas_src>

<mosaic_0001>
module attributes {stable_mosaic.version = 11 : i64} {
  func.func @_qkv_rope_kernel(%arg0: i32, %arg1: i32, %arg2: memref<1x16x32xbf16, #tpu.memory_space<vmem>>, %arg3: memref<32x64xbf16, #tpu.memory_space<vmem>>, %arg4: memref<16x4xf32, #tpu.memory_space<vmem>>, %arg5: memref<16x4xf32, #tpu.memory_space<vmem>>, %arg6: memref<1x4x16x8xbf16, #tpu.memory_space<vmem>>, %arg7: memref<1x2x16x8xbf16, #tpu.memory_space<vmem>>, %arg8: memref<1x2x16x8xbf16, #tpu.memory_space<vmem>>) attributes {dimension_semantics = [#tpu.dimension_semantics<parallel>, #tpu.dimension_semantics<parallel>], iteration_bounds = array<i64: 2, 1>, scalar_prefetch = 0 : i64, scratch_operands = 0 : i64, tpu.core_type = #tpu.core_type<tc>, window_params = [{transform_indices = @transform_0, window_bounds = array<i64: 1, 16, 32>}, {pipeline_mode = #tpu.pipeline_mode<synchronous>, transform_indices = @transform_1, window_bounds = array<i64: 32, 64>}, {transform_indices = @transform_2, window_bounds = array<i64: 16, 4>}, {transform_indices = @transform_3, window_bounds = array<i64: 16, 4>}, {transform_indices = @transform_4, window_bounds = array<i64: 1, 4, 16, 8>}, {transform_indices = @transform_5, window_bounds = array<i64: 1, 2, 16, 8>}, {transform_indices = @transform_6, window_bounds = array<i64: 1, 2, 16, 8>}]} {
    %c0 = arith.constant 0 : index
    %c0_0 = arith.constant 0 : index
    %c0_1 = arith.constant 0 : index
    %0 = vector.load %arg2[%c0, %c0_0, %c0_1] : memref<1x16x32xbf16, #tpu.memory_space<vmem>>, vector<1x16x32xbf16>
    %1 = vector.shape_cast %0 : vector<1x16x32xbf16> to vector<16x32xbf16>
    %c0_2 = arith.constant 0 : index
    %c0_3 = arith.constant 0 : index
    %2 = vector.load %arg3[%c0_2, %c0_3] : memref<32x64xbf16, #tpu.memory_space<vmem>>, vector<32x64xbf16>
    %cst = arith.constant dense<0.000000e+00> : vector<16x64xf32>
    %3 = tpu.matmul %1, %2, %cst {dimension_numbers = #tpu.dot_dimension_numbers<[1], [0], [0], [1], [0, 0, 1, 1], [], []>} : vector<16x32xbf16>, vector<32x64xbf16>, vector<16x64xf32> -> vector<16x64xf32>
    %4 = vector.extract_strided_slice %3 {offsets = [0, 0], sizes = [16, 16], strides = [1, 1]} : vector<16x64xf32> to vector<16x16xf32>
    %5 = vector.extract_strided_slice %3 {offsets = [0, 16], sizes = [16, 16], strides = [1, 1]} : vector<16x64xf32> to vector<16x16xf32>
    %6 = vector.extract_strided_slice %3 {offsets = [0, 32], sizes = [16, 8], strides = [1, 1]} : vector<16x64xf32> to vector<16x8xf32>
    %7 = vector.extract_strided_slice %3 {offsets = [0, 40], sizes = [16, 8], strides = [1, 1]} : vector<16x64xf32> to vector<16x8xf32>
    %8 = vector.extract_strided_slice %3 {offsets = [0, 48], sizes = [16, 16], strides = [1, 1]} : vector<16x64xf32> to vector<16x16xf32>
    %c0_4 = arith.constant 0 : index
    %c0_5 = arith.constant 0 : index
    %9 = vector.load %arg4[%c0_4, %c0_5] : memref<16x4xf32, #tpu.memory_space<vmem>>, vector<16x4xf32>
    %c0_6 = arith.constant 0 : index
    %c0_7 = arith.constant 0 : index
    %10 = vector.load %arg5[%c0_6, %c0_7] : memref<16x4xf32, #tpu.memory_space<vmem>>, vector<16x4xf32>
    %11 = tpu.concatenate %9, %9, %9, %9 in 1 : vector<16x4xf32>, vector<16x4xf32>, vector<16x4xf32>, vector<16x4xf32> -> vector<16x16xf32>
    %12 = tpu.concatenate %10, %10, %10, %10 in 1 : vector<16x4xf32>, vector<16x4xf32>, vector<16x4xf32>, vector<16x4xf32> -> vector<16x16xf32>
    %13 = tpu.concatenate %9, %9 in 1 : vector<16x4xf32>, vector<16x4xf32> -> vector<16x8xf32>
    %14 = tpu.concatenate %10, %10 in 1 : vector<16x4xf32>, vector<16x4xf32> -> vector<16x8xf32>
    %15 = arith.mulf %4, %11 : vector<16x16xf32>
    %16 = arith.mulf %5, %12 : vector<16x16xf32>
    %17 = arith.subf %15, %16 : vector<16x16xf32>
    %18 = arith.mulf %5, %11 : vector<16x16xf32>
    %19 = arith.mulf %4, %12 : vector<16x16xf32>
    %20 = arith.addf %18, %19 : vector<16x16xf32>
    %21 = arith.mulf %6, %13 : vector<16x8xf32>
    %22 = arith.mulf %7, %14 : vector<16x8xf32>
    %23 = arith.subf %21, %22 : vector<16x8xf32>
    %24 = arith.mulf %7, %13 : vector<16x8xf32>
    %25 = arith.mulf %6, %14 : vector<16x8xf32>
    %26 = arith.addf %24, %25 : vector<16x8xf32>
    %27 = vector.extract_strided_slice %17 {offsets = [0, 0], sizes = [16, 4], strides = [1, 1]} : vector<16x16xf32> to vector<16x4xf32>
    %28 = vector.extract_strided_slice %20 {offsets = [0, 0], sizes = [16, 4], strides = [1, 1]} : vector<16x16xf32> to vector<16x4xf32>
    %29 = tpu.concatenate %27, %28 in 1 : vector<16x4xf32>, vector<16x4xf32> -> vector<16x8xf32>
    %30 = arith.truncf %29 : vector<16x8xf32> to vector<16x8xbf16>
    %c0_8 = arith.constant 0 : index
    %c0_9 = arith.constant 0 : index
    %c0_10 = arith.constant 0 : index
    %c0_11 = arith.constant 0 : index
    %31 = vector.load %arg6[%c0_8, %c0_9, %c0_10, %c0_11] : memref<1x4x16x8xbf16, #tpu.memory_space<vmem>>, vector<1x1x16x8xbf16>
    %32 = vector.shape_cast %31 : vector<1x1x16x8xbf16> to vector<16x8xbf16>
    %33 = vector.shape_cast %30 : vector<16x8xbf16> to vector<1x1x16x8xbf16>
    tpu.vector_store %arg6[%c0_8, %c0_9, %c0_10, %c0_11], %33 {strides = array<i32>} : memref<1x4x16x8xbf16, #tpu.memory_space<vmem>>, vector<1x1x16x8xbf16>,
    %34 = vector.extract_strided_slice %17 {offsets = [0, 4], sizes = [16, 4], strides = [1, 1]} : vector<16x16xf32> to vector<16x4xf32>
    %35 = vector.extract_strided_slice %20 {offsets = [0, 4], sizes = [16, 4], strides = [1, 1]} : vector<16x16xf32> to vector<16x4xf32>
    %36 = tpu.concatenate %34, %35 in 1 : vector<16x4xf32>, vector<16x4xf32> -> vector<16x8xf32>
    %37 = arith.truncf %36 : vector<16x8xf32> to vector<16x8xbf16>
    %c0_12 = arith.constant 0 : index
    %c1 = arith.constant 1 : index
    %c0_13 = arith.constant 0 : index
    %c0_14 = arith.constant 0 : index
    %38 = vector.load %arg6[%c0_12, %c1, %c0_13, %c0_14] : memref<1x4x16x8xbf16, #tpu.memory_space<vmem>>, vector<1x1x16x8xbf16>
    %39 = vector.shape_cast %38 : vector<1x1x16x8xbf16> to vector<16x8xbf16>
    %40 = vector.shape_cast %37 : vector<16x8xbf16> to vector<1x1x16x8xbf16>
    tpu.vector_store %arg6[%c0_12, %c1, %c0_13, %c0_14], %40 {strides = array<i32>} : memref<1x4x16x8xbf16, #tpu.memory_space<vmem>>, vector<1x1x16x8xbf16>,
    %41 = vector.extract_strided_slice %17 {offsets = [0, 8], sizes = [16, 4], strides = [1, 1]} : vector<16x16xf32> to vector<16x4xf32>
    %42 = vector.extract_strided_slice %20 {offsets = [0, 8], sizes = [16, 4], strides = [1, 1]} : vector<16x16xf32> to vector<16x4xf32>
    %43 = tpu.concatenate %41, %42 in 1 : vector<16x4xf32>, vector<16x4xf32> -> vector<16x8xf32>
    %44 = arith.truncf %43 : vector<16x8xf32> to vector<16x8xbf16>
    %c0_15 = arith.constant 0 : index
    %c2 = arith.constant 2 : index
    %c0_16 = arith.constant 0 : index
    %c0_17 = arith.constant 0 : index
    %45 = vector.load %arg6[%c0_15, %c2, %c0_16, %c0_17] : memref<1x4x16x8xbf16, #tpu.memory_space<vmem>>, vector<1x1x16x8xbf16>
    %46 = vector.shape_cast %45 : vector<1x1x16x8xbf16> to vector<16x8xbf16>
    %47 = vector.shape_cast %44 : vector<16x8xbf16> to vector<1x1x16x8xbf16>
    tpu.vector_store %arg6[%c0_15, %c2, %c0_16, %c0_17], %47 {strides = array<i32>} : memref<1x4x16x8xbf16, #tpu.memory_space<vmem>>, vector<1x1x16x8xbf16>,
    %48 = vector.extract_strided_slice %17 {offsets = [0, 12], sizes = [16, 4], strides = [1, 1]} : vector<16x16xf32> to vector<16x4xf32>
    %49 = vector.extract_strided_slice %20 {offsets = [0, 12], sizes = [16, 4], strides = [1, 1]} : vector<16x16xf32> to vector<16x4xf32>
    %50 = tpu.concatenate %48, %49 in 1 : vector<16x4xf32>, vector<16x4xf32> -> vector<16x8xf32>
    %51 = arith.truncf %50 : vector<16x8xf32> to vector<16x8xbf16>
    %c0_18 = arith.constant 0 : index
    %c3 = arith.constant 3 : index
    %c0_19 = arith.constant 0 : index
    %c0_20 = arith.constant 0 : index
    %52 = vector.load %arg6[%c0_18, %c3, %c0_19, %c0_20] : memref<1x4x16x8xbf16, #tpu.memory_space<vmem>>, vector<1x1x16x8xbf16>
    %53 = vector.shape_cast %52 : vector<1x1x16x8xbf16> to vector<16x8xbf16>
    %54 = vector.shape_cast %51 : vector<16x8xbf16> to vector<1x1x16x8xbf16>
    tpu.vector_store %arg6[%c0_18, %c3, %c0_19, %c0_20], %54 {strides = array<i32>} : memref<1x4x16x8xbf16, #tpu.memory_space<vmem>>, vector<1x1x16x8xbf16>,
    %55 = vector.extract_strided_slice %23 {offsets = [0, 0], sizes = [16, 4], strides = [1, 1]} : vector<16x8xf32> to vector<16x4xf32>
    %56 = vector.extract_strided_slice %26 {offsets = [0, 0], sizes = [16, 4], strides = [1, 1]} : vector<16x8xf32> to vector<16x4xf32>
    %57 = tpu.concatenate %55, %56 in 1 : vector<16x4xf32>, vector<16x4xf32> -> vector<16x8xf32>
    %58 = arith.truncf %57 : vector<16x8xf32> to vector<16x8xbf16>
    %c0_21 = arith.constant 0 : index
    %c0_22 = arith.constant 0 : index
    %c0_23 = arith.constant 0 : index
    %c0_24 = arith.constant 0 : index
    %59 = vector.load %arg7[%c0_21, %c0_22, %c0_23, %c0_24] : memref<1x2x16x8xbf16, #tpu.memory_space<vmem>>, vector<1x1x16x8xbf16>
    %60 = vector.shape_cast %59 : vector<1x1x16x8xbf16> to vector<16x8xbf16>
    %61 = vector.shape_cast %58 : vector<16x8xbf16> to vector<1x1x16x8xbf16>
    tpu.vector_store %arg7[%c0_21, %c0_22, %c0_23, %c0_24], %61 {strides = array<i32>} : memref<1x2x16x8xbf16, #tpu.memory_space<vmem>>, vector<1x1x16x8xbf16>,
    %62 = vector.extract_strided_slice %8 {offsets = [0, 0], sizes = [16, 8], strides = [1, 1]} : vector<16x16xf32> to vector<16x8xf32>
    %63 = arith.truncf %62 : vector<16x8xf32> to vector<16x8xbf16>
    %c0_25 = arith.constant 0 : index
    %c0_26 = arith.constant 0 : index
    %c0_27 = arith.constant 0 : index
    %c0_28 = arith.constant 0 : index
    %64 = vector.load %arg8[%c0_25, %c0_26, %c0_27, %c0_28] : memref<1x2x16x8xbf16, #tpu.memory_space<vmem>>, vector<1x1x16x8xbf16>
    %65 = vector.shape_cast %64 : vector<1x1x16x8xbf16> to vector<16x8xbf16>
    %66 = vector.shape_cast %63 : vector<16x8xbf16> to vector<1x1x16x8xbf16>
    tpu.vector_store %arg8[%c0_25, %c0_26, %c0_27, %c0_28], %66 {strides = array<i32>} : memref<1x2x16x8xbf16, #tpu.memory_space<vmem>>, vector<1x1x16x8xbf16>,
    %67 = vector.extract_strided_slice %23 {offsets = [0, 4], sizes = [16, 4], strides = [1, 1]} : vector<16x8xf32> to vector<16x4xf32>
    %68 = vector.extract_strided_slice %26 {offsets = [0, 4], sizes = [16, 4], strides = [1, 1]} : vector<16x8xf32> to vector<16x4xf32>
    %69 = tpu.concatenate %67, %68 in 1 : vector<16x4xf32>, vector<16x4xf32> -> vector<16x8xf32>
    %70 = arith.truncf %69 : vector<16x8xf32> to vector<16x8xbf16>
    %c0_29 = arith.constant 0 : index
    %c1_30 = arith.constant 1 : index
    %c0_31 = arith.constant 0 : index
    %c0_32 = arith.constant 0 : index
    %71 = vector.load %arg7[%c0_29, %c1_30, %c0_31, %c0_32] : memref<1x2x16x8xbf16, #tpu.memory_space<vmem>>, vector<1x1x16x8xbf16>
    %72 = vector.shape_cast %71 : vector<1x1x16x8xbf16> to vector<16x8xbf16>
    %73 = vector.shape_cast %70 : vector<16x8xbf16> to vector<1x1x16x8xbf16>
    tpu.vector_store %arg7[%c0_29, %c1_30, %c0_31, %c0_32], %73 {strides = array<i32>} : memref<1x2x16x8xbf16, #tpu.memory_space<vmem>>, vector<1x1x16x8xbf16>,
    %74 = vector.extract_strided_slice %8 {offsets = [0, 8], sizes = [16, 8], strides = [1, 1]} : vector<16x16xf32> to vector<16x8xf32>
    %75 = arith.truncf %74 : vector<16x8xf32> to vector<16x8xbf16>
    %c0_33 = arith.constant 0 : index
    %c1_34 = arith.constant 1 : index
    %c0_35 = arith.constant 0 : index
    %c0_36 = arith.constant 0 : index
    %76 = vector.load %arg8[%c0_33, %c1_34, %c0_35, %c0_36] : memref<1x2x16x8xbf16, #tpu.memory_space<vmem>>, vector<1x1x16x8xbf16>
    %77 = vector.shape_cast %76 : vector<1x1x16x8xbf16> to vector<16x8xbf16>
    %78 = vector.shape_cast %75 : vector<16x8xbf16> to vector<1x1x16x8xbf16>
    tpu.vector_store %arg8[%c0_33, %c1_34, %c0_35, %c0_36], %78 {strides = array<i32>} : memref<1x2x16x8xbf16, #tpu.memory_space<vmem>>, vector<1x1x16x8xbf16>,
    return
  }
  func.func @transform_0(%arg0: i32, %arg1: i32) -> (i32, i32, i32) {
    %c0_i32 = arith.constant 0 : i32
    %c0_i32_0 = arith.constant 0 : i32
    return %arg0, %arg1, %c0_i32 : i32, i32, i32
  }
  func.func @transform_1(%arg0: i32, %arg1: i32) -> (i32, i32) {
    %c0_i32 = arith.constant 0 : i32
    %c0_i32_0 = arith.constant 0 : i32
    %c0_i32_1 = arith.constant 0 : i32
    return %c0_i32, %c0_i32_0 : i32, i32
  }
  func.func @transform_2(%arg0: i32, %arg1: i32) -> (i32, i32) {
    %c0_i32 = arith.constant 0 : i32
    %c0_i32_0 = arith.constant 0 : i32
    return %arg1, %c0_i32 : i32, i32
  }
  func.func @transform_3(%arg0: i32, %arg1: i32) -> (i32, i32) {
    %c0_i32 = arith.constant 0 : i32
    %c0_i32_0 = arith.constant 0 : i32
    return %arg1, %c0_i32 : i32, i32
  }
  func.func @transform_4(%arg0: i32, %arg1: i32) -> (i32, i32, i32, i32) {
    %c0_i32 = arith.constant 0 : i32
    %c0_i32_0 = arith.constant 0 : i32
    %c0_i32_1 = arith.constant 0 : i32
    return %arg0, %c0_i32, %arg1, %c0_i32_0 : i32, i32, i32, i32
  }
  func.func @transform_5(%arg0: i32, %arg1: i32) -> (i32, i32, i32, i32) {
    %c0_i32 = arith.constant 0 : i32
    %c0_i32_0 = arith.constant 0 : i32
    %c0_i32_1 = arith.constant 0 : i32
    return %arg0, %c0_i32, %arg1, %c0_i32_0 : i32, i32, i32, i32
  }
  func.func @transform_6(%arg0: i32, %arg1: i32) -> (i32, i32, i32, i32) {
    %c0_i32 = arith.constant 0 : i32
    %c0_i32_0 = arith.constant 0 : i32
    %c0_i32_1 = arith.constant 0 : i32
    return %arg0, %c0_i32, %arg1, %c0_i32_0 : i32, i32, i32, i32
  }
}

</mosaic_0001>

<bundles_post_ra>
// kernel: tpu_custom_call.1
= control target key start
LH: loop header
LB: loop body
LE: loop exit
PB: predicated region body
PF: predicated region fallthrough
CT: control target
= control target key end

     0   :  { %s1254_s21 = smov 0   ;;  %s1256_s22 = smov 0   ;;  %s1443_s0 = inlined_call_operand.vmem [shape: bf16[2,16,32], index: 0, kind: input, shape index: {}]   ;;  %s1444_s1 = inlined_call_operand.vmem [shape: bf16[32,64], index: 1, kind: input, shape index: {}]   ;;  %s1445_s2 = inlined_call_operand.vmem [shape: f32[16,4], index: 2, kind: input, shape index: {}]   ;;  %s1446_s3 = inlined_call_operand.vmem [shape: f32[16,4], index: 3, kind: input, shape index: {}]   ;;  %s1447_s4 = inlined_call_operand.vmem [shape: bf16[2,4,16,8], index: 4, kind: output, shape index: {0}]   ;;  %s1448_s5 = inlined_call_operand.vmem [shape: bf16[2,2,16,8], index: 5, kind: output, shape index: {1}]   ;;  %s1449_s6 = inlined_call_operand.vmem [shape: bf16[2,2,16,8], index: 6, kind: output, shape index: {2}]  }
   0x1   :  { %s1258_s23 = smov 0  }
   0x2 LB: > { %s29_s24 = sadd.s32 1, %s1194_s22  ;;  %p1007_p0 = scmp.ge.s32.totalorder %s1198_s23, 1  ;;  %s1198_s23 = sphi %s1258_s23, %s17_s23   ;;  %s1194_s22 = sphi %s1256_s22, %s1451_s22   ;;  %s1190_s21 = sphi %s1254_s21, %s1450_s21  }
   0x3   : > { %p31_p1 = scmp.ge.s32.totalorder %s29_s24, 2  ;;  %p264_p2 = scmp.lt.s32.totalorder %s1198_s23, 3 }
   0x5   : > { %s1453_s24 = smov (%p31_p1, %s29_s24), 0  ;;  %p265_p3 = pnand %p1007_p0, %p264_p2 }
   0x6   : > { %v453_v0 = vld [vmem:[%s1446_s3] sm:$0xff] (!%p265_p3)  ;;  %s1200_s27 = smov (!%p265_p3), 8   ;;  %s1201_s28 = smov (!%p265_p3), 4   ;;  %v1202_v2 = vmov (!%p265_p3), 0.0   ;;  %v454_v3 = vld [vmem:[%s1446_s3 + $0x8] sm:$0xff] (!%p265_p3)  ;;  %vm1203_vm0 = vmmov (!%p265_p3), 0  }
   0x7   : > { %268 = sbr.rel (%p265_p3) target bundleno = 500 (0x1f4), region = 36  ;;  %492 = vrot.lane.b32.xlu1 (!%p265_p3), %v453_v0, %s1200_s27  ;;  %486 = vrot.lane.b32.xlu0 (!%p265_p3), %v453_v0, %s1201_s28  ;;  %v1173_v1 = vld [vmem:[%s1444_s1] sm:$0xff] (!%p265_p3)   ;;  %p331_p4 = scmp.lt.s32.totalorder (!%p265_p3), %s1190_s21, 1  ;;  %v1174_v4 = vld [vmem:[%s1444_s1 + $0x8] sm:$0xff] (!%p265_p3)   ;;  %vm406_vm1 = vcmask (!%p265_p3), 261120   ;;  %vm475_vm2 = vcmask (!%p265_p3), 31744  }
   0x8   : > { %1067 = vmatprep.subr.bf16.mxu0 (!%p265_p3), %v1202_v2  ;;  %1071 = vmatprep.mubr.msk.bf16.mxu0 (!%p265_p3), %vm1203_vm0, %v1202_v2  ;;  %s1204_s15 = smov (!%p265_p3), 12   ;;  %v452_v6 = vld [vmem:[%s1445_s2 + $0x8] sm:$0xff] (!%p265_p3)  ;;  %v451_v7 = vld [vmem:[%s1445_s2] sm:$0xff] (!%p265_p3)  ;;  %s1205_s20 = smov (!%p265_p3), 40   ;;  %vm478_vm3 = vcmask (!%p265_p3), 64512   ;;  %vm481_vm4 = vcmask (!%p265_p3), 97280  }
   0x9   : > { %1068 = vmatpush3.bf16.msra.mxu0 (!%p265_p3), %v1173_v1  ;;  %s1206_s25 = smov (!%p265_p3), 16   ;;  %s1207_s26 = smov (!%p265_p3), 32   ;;  %vm628_vm5 = vcmask (!%p265_p3), 60416  }
   0xa   : > { %1069 = vmatprep.subr.bf16.mxu0 (!%p265_p3), %v1202_v2  ;;  %s1209_s29 = smov (!%p265_p3), 112   ;;  %s1210_s30 = smov (!%p265_p3), 80  }
   0xb   : > { %494 = vrot.lane.b32.xlu1 (!%p265_p3), %v454_v3, %s1200_s27  ;;  %488 = vrot.lane.b32.xlu0 (!%p265_p3), %v454_v3, %s1201_s28  ;;  %s1212_s7 = smov (!%p265_p3), 108   ;;  %s1213_s8 = smov (!%p265_p3), 104  }
   0xc   : > { %s1214_s9 = smov (!%p265_p3), 96   ;;  %s1217_s16 = smov (!%p265_p3), 88  }
   0xd   : > { %1070 = vmatpush3.bf16.msra.mxu0 (!%p265_p3), %v1174_v4  ;;  %s1218_s17 = smov (!%p265_p3), 72  }
   0xe   : > { %s1455_s21 = smov (!%p331_p4, %s1190_s21), 1 }
   0xf   : > { %s1046_s11 = sshll.u32 %s1455_s21, 3  ;;  %500 = vrot.lane.b32.xlu1 %v454_v3, %s1204_s15  ;;  %498 = vrot.lane.b32.xlu0 %v453_v0, %s1204_s15  ;;  %s1048_s10 = sshll.u32 %s1455_s21, 4 }
  0x10   : > { %s338_s14 = scalar_lea.vmem %s1443_s0, %s1046_s11  ;;  %s1215_s11 = smov 92  }
  0x11   : > { %v1175_v5 = vld [vmem:[%s338_s14] sm:$0xff]   ;;  %s1371_s14 = scalar_lea.vmem %s1449_s6, %s1048_s10  ;;  %s1047_s18 = sshll.u32 %s1455_s21, 5 }
  0x12   : > { %1072 = vmatmul.mubr.msk.bf16.vlgmr.msra.gmra.mrb[0].mxu0 %vm406_vm1, %v1175_v5 }
  0x13   : > { %459 = vrot.lane.b32.xlu1 %v452_v6, %s1201_s28  ;;  %457 = vrot.lane.b32.xlu0 %v451_v7, %s1201_s28  ;;  %s1208_s28 = smov 120  }
  0x17   : > { %465 = vrot.lane.b32.xlu1 %v452_v6, %s1200_s27  ;;  %463 = vrot.lane.b32.xlu0 %v451_v7, %s1200_s27 }
  0x1b   : > { %471 = vrot.lane.b32.xlu1 %v452_v6, %s1204_s15  ;;  %469 = vrot.lane.b32.xlu0 %v451_v7, %s1204_s15  ;;  %s1216_s15 = smov 124  }
  0x79   : > { %v493_v8 = vpop.permute.xlu1 %492  ;;  %v487_v9 = vpop.permute.xlu0 %486 }
  0x7a   : > { %v504_v10 = vsel %vm475_vm2, %v453_v0, %v487_v9 }
  0x7b   : > { %566 = vrot.lane.b32.xlu0 %v504_v10, %s1205_s20  ;;  %v506_v17 = vsel %vm478_vm3, %v504_v10, %v493_v8 }
  0x7d   : > { %v495_v11 = vpop.permute.xlu1 %494  ;;  %v489_v12 = vpop.permute.xlu0 %488 }
  0x7e   : > { %v505_v13 = vsel %vm475_vm2, %v454_v3, %v489_v12 }
  0x7f   : > { %568 = vrot.lane.b32.xlu1 %v505_v13, %s1205_s20  ;;  %v507_v16 = vsel %vm478_vm3, %v505_v13, %v495_v11 }
  0x81   : > { %v501_v14 = vpop.permute.xlu1 %500  ;;  %v499_v15 = vpop.permute.xlu0 %498 }
  0x82   : > { %v509_v18 = vsel %vm481_vm4, %v507_v16, %v501_v14  ;;  %v508_v19 = vsel %vm481_vm4, %v506_v17, %v499_v15 }
  0x83   : > { %516 = vrot.lane.b32.xlu1 %v509_v18, %s1206_s25  ;;  %514 = vrot.lane.b32.xlu0 %v508_v19, %s1206_s25 }
  0x85   : > { %v460_v20 = vpop.permute.xlu1 %459  ;;  %v458_v21 = vpop.permute.xlu0 %457 }
  0x86   : > { %v477_v22 = vsel %vm475_vm2, %v452_v6, %v460_v20  ;;  %v476_v23 = vsel %vm475_vm2, %v451_v7, %v458_v21 }
  0x87   : > { %594 = vrot.lane.b32.xlu1 %v505_v13, %s1207_s26  ;;  %592 = vrot.lane.b32.xlu0 %v504_v10, %s1207_s26 }
  0x89   : > { %v466_v24 = vpop.permute.xlu1 %465  ;;  %v464_v25 = vpop.permute.xlu0 %463 }
  0x8a   : > { %v480_v26 = vsel %vm478_vm3, %v477_v22, %v466_v24  ;;  %v479_v27 = vsel %vm478_vm3, %v476_v23, %v464_v25 }
  0x8b   : > { %558 = vrot.lane.b32.xlu1 %v477_v22, %s1207_s26  ;;  %556 = vrot.lane.b32.xlu0 %v476_v23, %s1207_s26 }
  0x8d   : > { %v472_v28 = vpop.permute.xlu1 %471  ;;  %v470_v29 = vpop.permute.xlu0 %469 }
  0x8e   : > { %v1317_v30 = vsel %vm481_vm4, %v480_v26, %v472_v28  ;;  %v1320_v31 = vsel %vm481_vm4, %v479_v27, %v470_v29 }
  0x8f   : > { %586 = vrot.lane.b32.xlu1 %v477_v22, %s1205_s20  ;;  %584 = vrot.lane.b32.xlu0 %v476_v23, %s1205_s20 }
  0x93   : > { %536 = vrot.lane.b32.xlu1 %v1317_v30, %s1206_s25  ;;  %534 = vrot.lane.b32.xlu0 %v1320_v31, %s1206_s25 }
  0xe5   : > { %v1326_v32 = vpop.f32.mrb[0].mxu0 }
  0xe6   : > { %v1073_v33 = vpop.f32.mrb[1].mxu0  ;;  %v542_v34 = vmul.f32 %v508_v19, %v1326_v32  ;;  %v1350_v51 = vpack.c.bf16 %v1326_v32, %v1326_v32  ;;  %v510_v10 = vmul.f32 %v1320_v31, %v1326_v32 }
  0xe7   : > { %v1329_v35 = vpop.f32.mrb[2].mxu0 }
  0xe8   : > { %546 = vrot.lane.b32.xlu0 %v542_v34, %s1206_s25  ;;  %v543_v36 = vmul.f32 %v509_v18, %v1329_v35  ;;  %v1074_v37 = vpop.f32.mrb[3].mxu0  ;;  %v1346_v50 = vpack.c.bf16 %v1329_v35, %v1329_v35  ;;  %v511_v11 = vmul.f32 %v1317_v30, %v1329_v35 }
  0xea   : > { %548 = vrot.lane.b32.xlu1 %v543_v36, %s1206_s25  ;;  %s1385_s25 = scalar_lea.vmem %s1447_s4, %s1047_s18 }
  0xed   : > { %v567_v38 = vpop.permute.xlu0 %566 }
  0xee   : > { %v572_v39 = vmul.f32 %v567_v38, %v1326_v32 }
  0xf0   : > { %576 = vrot.lane.b32.xlu0 %v572_v39, %s1208_s28 }
  0xf1   : > { %v569_v40 = vpop.permute.xlu1 %568 }
  0xf2   : > { %v573_v41 = vmul.f32 %v569_v40, %v1329_v35 }
  0xf4   : > { %578 = vrot.lane.b32.xlu1 %v573_v41, %s1208_s28 }
  0xf5   : > { %v517_v42 = vpop.permute.xlu1 %516  ;;  %v515_v43 = vpop.permute.xlu0 %514 }
  0xf6   : > { %v521_v44 = vmul.f32 %v517_v42, %v1329_v35  ;;  %v520_v45 = vmul.f32 %v515_v43, %v1326_v32 }
  0xf8   : > { %524 = vrot.lane.b32.xlu0 %v520_v45, %s1209_s29  ;;  %526 = vrot.lane.b32.xlu1 %v521_v44, %s1209_s29 }
  0xf9   : > { %v595_v46 = vpop.permute.xlu1 %594  ;;  %v593_v47 = vpop.permute.xlu0 %592 }
  0xfa   : > { %v599_v48 = vmul.f32 %v595_v46, %v1329_v35  ;;  %v598_v49 = vmul.f32 %v593_v47, %v1326_v32 }
  0xfc   : > { %602 = vrot.lane.b32.xlu0 %v598_v49, %s1200_s27  ;;  %604 = vrot.lane.b32.xlu1 %v599_v48, %s1200_s27  ;;  %s1211_s27 = smov 116  }
  0xfd   : > { %v557_v52 = vpop.permute.xlu0 %556  ;;  %v559_v53 = vpop.permute.xlu1 %558 }
  0xfe   : > { %v563_v2 = vmul.f32 %v559_v53, %v1329_v35  ;;  %v562_v3 = vmul.f32 %v557_v52, %v1326_v32 }
 0x100   : > { %744 = vrot.lane.b32.xlu0 %v1346_v50, %s1210_s30  ;;  %742 = vrot.lane.b32.xlu1 %v1350_v51, %s1210_s30 }
 0x101   : > { %v585_v54 = vpop.permute.xlu0 %584  ;;  %v587_v55 = vpop.permute.xlu1 %586 }
 0x102   : > { %v591_v12 = vmul.f32 %v587_v55, %v1329_v35  ;;  %v590_v13 = vmul.f32 %v585_v54, %v1326_v32 }
 0x105   : > { %v535_v56 = vpop.permute.xlu0 %534  ;;  %v537_v57 = vpop.permute.xlu1 %536 }
 0x106   : > { %v541_v59 = vmul.f32 %v537_v57, %v1329_v35  ;;  %v540_v60 = vmul.f32 %v535_v56, %v1326_v32 }
 0x15a   : > { %v547_v58 = vpop.permute.xlu0 %546 }
 0x15b   : > { %v552_v62 = vadd.f32 %v547_v58, %v540_v60 }
 0x15c   : > { %v549_v61 = vpop.permute.xlu1 %548 }
 0x15d   : > { %v553_v63 = vadd.f32 %v549_v61, %v541_v59 }
 0x15f   : > { %v1118_v0 = vpack.i.bf16 %v553_v63, %v552_v62 }
 0x161   : > { %1119 = vrot.lane.b32.xlu0 %v1118_v0, %s1211_s27 }
 0x162   : > { %v577_v1 = vpop.permute.xlu0 %576 }
 0x163   : > { %v582_v5 = vsub.f32 %v562_v3, %v577_v1 }
 0x165   : > { %1124 = vrot.lane.b32.xlu0 %v1118_v0, %s1209_s29  ;;  %s1398_s29 = scalar_lea.vmem %s1448_s5, %s1048_s10 }
 0x166   : > { %v579_v4 = vpop.permute.xlu1 %578 }
 0x167   : > { %v583_v6 = vsub.f32 %v563_v2, %v579_v4 }
 0x169   : > { %1129 = vrot.lane.b32.xlu0 %v1118_v0, %s1212_s7  ;;  %v1148_v7 = vpack.i.bf16 %v583_v6, %v582_v5 }
 0x16a   : > { %v525_v8 = vpop.permute.xlu0 %524  ;;  %v527_v9 = vpop.permute.xlu1 %526 }
 0x16b   : > { %1139 = vrot.lane.b32.xlu1 %v1148_v7, %s1214_s9  ;;  %v530_v14 = vsub.f32 %v510_v10, %v525_v8  ;;  %v531_v15 = vsub.f32 %v511_v11, %v527_v9 }
 0x16d   : > { %1134 = vrot.lane.b32.xlu0 %v1118_v0, %s1213_s8  ;;  %v1158_v21 = vpack.i.bf16 %v531_v15, %v530_v14 }
 0x16e   : > { %v603_v16 = vpop.permute.xlu0 %602  ;;  %v605_v17 = vpop.permute.xlu1 %604 }
 0x16f   : > { %v608_v18 = vadd.f32 %v603_v16, %v590_v13  ;;  %v609_v19 = vadd.f32 %v605_v17, %v591_v12  ;;  %1149 = vrot.lane.b32.xlu1 %v1148_v7, %s1215_s11 }
 0x171   : > { %v1153_v20 = vpack.i.bf16 %v609_v19, %v608_v18 }
 0x172   : > { %v745_v22 = vpop.permute.xlu0 %744  ;;  %v743_v23 = vpop.permute.xlu1 %742 }
 0x173   : > { %749 = vst.msk [vmem:[%s1371_s14 + $0x4] sm:$0xf] %vm628_vm5, %v745_v22  ;;  %748 = vst.msk [vmem:[%s1371_s14] sm:$0xf] %vm628_vm5, %v743_v23  ;;  %1144 = vrot.lane.b32.xlu0 %v1153_v20, %s1215_s11  ;;  %1159 = vrot.lane.b32.xlu1 %v1158_v21, %s1216_s15 }
 0x177   : > { %1154 = vrot.lane.b32.xlu0 %v1153_v20, %s1217_s16  ;;  %1164 = vrot.lane.b32.xlu1 %v1158_v21, %s1208_s28 }
 0x17b   : > { %777 = vrot.lane.b32.xlu0 %v1346_v50, %s1218_s17  ;;  %1169 = vrot.lane.b32.xlu1 %v1158_v21, %s1211_s27 }
 0x17f   : > { %775 = vrot.lane.b32.xlu1 %v1350_v51, %s1218_s17 }
 0x1d3   : > { %v1120_v24 = vpop.permute.xlu0 %1119 }
 0x1d4   : > { %v1122_v25 = vunpack.i.h.bf16 %v1120_v24  ;;  %v1121_v26 = vunpack.i.l.bf16 %v1120_v24 }
 0x1d6   : > { %v618_v27 = vsel %vm475_vm2, %v530_v14, %v1121_v26  ;;  %v619_v28 = vsel %vm475_vm2, %v531_v15, %v1122_v25 }
 0x1d7   : > { %v1050_v29 = vpack.c.bf16 %v618_v27, %v618_v27  ;;  %v1051_v30 = vpack.c.bf16 %v619_v28, %v619_v28  ;;  %v1125_v31 = vpop.permute.xlu0 %1124 }
 0x1d8   : > { %v1127_v36 = vunpack.i.h.bf16 %v1125_v31  ;;  %v1126_v37 = vunpack.i.l.bf16 %v1125_v31 }
 0x1d9   : > { %629 = vst.msk [vmem:[%s1385_s25] sm:$0xf] %vm628_vm5, %v1050_v29  ;;  %630 = vst.msk [vmem:[%s1385_s25 + $0x4] sm:$0xf] %vm628_vm5, %v1051_v30 }
 0x1db   : > { %v1130_v32 = vpop.permute.xlu0 %1129 }
 0x1dc   : > { %v1132_v46 = vunpack.i.h.bf16 %v1130_v32  ;;  %v1131_v47 = vunpack.i.l.bf16 %v1130_v32 }
 0x1dd   : > { %v1140_v33 = vpop.permute.xlu1 %1139 }
 0x1de   : > { %v1142_v38 = vunpack.i.h.bf16 %v1140_v33  ;;  %v1141_v39 = vunpack.i.l.bf16 %v1140_v33 }
 0x1df   : > { %v1135_v34 = vpop.permute.xlu0 %1134 }
 0x1e0   : > { %v1137_v10 = vunpack.i.h.bf16 %v1135_v34  ;;  %v1136_v11 = vunpack.i.l.bf16 %v1135_v34 }
 0x1e1   : > { %v1150_v35 = vpop.permute.xlu1 %1149 }
 0x1e2   : > { %v1152_v48 = vunpack.i.h.bf16 %v1150_v35  ;;  %v1151_v49 = vunpack.i.l.bf16 %v1150_v35 }
 0x1e5   : > { %v1145_v40 = vpop.permute.xlu0 %1144  ;;  %v1160_v41 = vpop.permute.xlu1 %1159 }
 0x1e6   : > { %v1147_v42 = vunpack.i.h.bf16 %v1145_v40  ;;  %v1146_v43 = vunpack.i.l.bf16 %v1145_v40  ;;  %v1162_v44 = vunpack.i.h.bf16 %v1160_v41  ;;  %v1161_v45 = vunpack.i.l.bf16 %v1160_v41 }
 0x1e8   : > { %v724_v50 = vsel %vm475_vm2, %v1141_v39, %v1146_v43  ;;  %v725_v51 = vsel %vm475_vm2, %v1142_v38, %v1147_v42  ;;  %v646_v52 = vsel %vm475_vm2, %v1162_v44, %v1127_v36  ;;  %v645_v53 = vsel %vm475_vm2, %v1161_v45, %v1126_v37 }
 0x1e9   : > { %v1058_v54 = vpack.c.bf16 %v724_v50, %v724_v50  ;;  %v1059_v55 = vpack.c.bf16 %v725_v51, %v725_v51  ;;  %v1053_v56 = vpack.c.bf16 %v646_v52, %v646_v52  ;;  %v1052_v57 = vpack.c.bf16 %v645_v53, %v645_v53  ;;  %v1155_v58 = vpop.permute.xlu0 %1154  ;;  %v1165_v59 = vpop.permute.xlu1 %1164 }
 0x1ea   : > { %v1157_v60 = vunpack.i.h.bf16 %v1155_v58  ;;  %v1156_v61 = vunpack.i.l.bf16 %v1155_v58  ;;  %v1167_v62 = vunpack.i.h.bf16 %v1165_v59  ;;  %v1166_v63 = vunpack.i.l.bf16 %v1165_v59 }
 0x1eb   : > { %734 = vst.msk [vmem:[%s1398_s29] sm:$0xf] %vm628_vm5, %v1058_v54  ;;  %735 = vst.msk [vmem:[%s1398_s29 + $0x4] sm:$0xf] %vm628_vm5, %v1059_v55 }
 0x1ec   : > { %1025 = vst.msk [vmem:[%s1385_s25 + $0xc] sm:$0xf] %vm628_vm5, %v1053_v56  ;;  %1024 = vst.msk [vmem:[%s1385_s25 + $0x8] sm:$0xf] %vm628_vm5, %v1052_v57  ;;  %v762_v0 = vsel %vm475_vm2, %v1151_v49, %v1156_v61  ;;  %v763_v1 = vsel %vm475_vm2, %v1152_v48, %v1157_v60  ;;  %v671_v2 = vsel %vm475_vm2, %v1167_v62, %v1132_v46 }
 0x1ed   : > { %v670_v3 = vsel %vm475_vm2, %v1166_v63, %v1131_v47  ;;  %v1062_v4 = vpack.c.bf16 %v762_v0, %v762_v0  ;;  %v1063_v5 = vpack.c.bf16 %v763_v1, %v763_v1  ;;  %v1055_v6 = vpack.c.bf16 %v671_v2, %v671_v2  ;;  %v778_v8 = vpop.permute.xlu0 %777  ;;  %v1170_v9 = vpop.permute.xlu1 %1169 }
 0x1ee   : > { %v1054_v7 = vpack.c.bf16 %v670_v3, %v670_v3  ;;  %1043 = vst.msk [vmem:[%s1371_s14 + $0xc] sm:$0xf] %vm628_vm5, %v778_v8  ;;  %v1172_v12 = vunpack.i.h.bf16 %v1170_v9  ;;  %v1171_v13 = vunpack.i.l.bf16 %v1170_v9 }
 0x1ef   : > { %1040 = vst.msk [vmem:[%s1398_s29 + $0x8] sm:$0xf] %vm628_vm5, %v1062_v4  ;;  %1041 = vst.msk [vmem:[%s1398_s29 + $0xc] sm:$0xf] %vm628_vm5, %v1063_v5 }
 0x1f0   : > { %1029 = vst.msk [vmem:[%s1385_s25 + $0x14] sm:$0xf] %vm628_vm5, %v1055_v6  ;;  %1028 = vst.msk [vmem:[%s1385_s25 + $0x10] sm:$0xf] %vm628_vm5, %v1054_v7  ;;  %v696_v14 = vsel %vm475_vm2, %v1172_v12, %v1137_v10  ;;  %v695_v15 = vsel %vm475_vm2, %v1171_v13, %v1136_v11 }
 0x1f1   : > { %v1057_v16 = vpack.c.bf16 %v696_v14, %v696_v14  ;;  %v1056_v17 = vpack.c.bf16 %v695_v15, %v695_v15  ;;  %v776_v18 = vpop.permute.xlu1 %775 }
 0x1f2   : > { %1042 = vst.msk [vmem:[%s1371_s14 + $0x8] sm:$0xf] %vm628_vm5, %v776_v18 }
 0x1f3   : > { %1033 = vst.msk [vmem:[%s1385_s25 + $0x1c] sm:$0xf] %vm628_vm5, %v1057_v16  ;;  %1032 = vst.msk [vmem:[%s1385_s25 + $0x18] sm:$0xf] %vm628_vm5, %v1056_v17 }
 0x1f4 PF: > { %s17_s23 = sadd.s32 1, %s1198_s23   ;;  %s1450_s21 = smov %s1194_s22 }
 0x1f5   : > { %p14_p5 = scmp.ge.s32.totalorder %s17_s23, 4   ;;  %s1451_s22 = smov %s1453_s24 }
 0x1f7   :  { %16 = sbr.rel (!%p14_p5) target bundleno = 2 (0x2), region = 101 }

</bundles_post_ra>
